<compile_context>
chip_gen: v5e
topology: v5e:2x2
jax: 0.10.0
libtpu: 0.0.40
codegen_flags: <defaults>
</compile_context>

<pallas_src>
import functools

import jax
import jax.numpy as jnp
from jax.experimental import pallas as pl
from jax.experimental.pallas import tpu as pltpu

NEG_SLOPE = 0.01          # F.leaky_relu default
HIDDEN = 100              # nn.Linear(x_dim, 100)
HIDDEN_PAD = 128          # zero-padded hidden width (lane-full)
OUT = 32                  # nn.Linear(100, 32)
PACK = 4                  # batch rows packed per 128-lane output row (4 * 32 = 128)
DEFAULT_TB = 2048         # packed rows per grid step (= 8192 batch rows)


def _leaky_relu(v):
    return jnp.where(v > 0, v, NEG_SLOPE * v)


def _mlp_kernel(x_ref, w1_ref, b1_ref, w2_ref, b2_ref, o_ref):
    # layer 1: (TB, PACK*x_dim) @ (PACK*x_dim, PACK*128) -> (TB, PACK*128), f32 acc
    h = jnp.dot(x_ref[...], w1_ref[...], preferred_element_type=jnp.float32)
    h = _leaky_relu(h + b1_ref[...])                       # bias + activation in f32
    # layer 2: (TB, PACK*128) @ (PACK*128, PACK*32) -> (TB, 128)  lane-dense store
    o = jnp.dot(h.astype(w2_ref.dtype), w2_ref[...],
                preferred_element_type=jnp.float32)
    o = _leaky_relu(o + b2_ref[...])
    o_ref[...] = o.astype(o_ref.dtype)


def _round_up(n, m):
    return ((n + m - 1) // m) * m


def pack_params(w1, b1, w2, b2, compute_dtype=jnp.bfloat16):
    """One-time weight preprocessing, hoisted out of the per-call hot path.

    w1: (x_dim, 100), b1: (1, 100), w2: (100, 32), b2: (1, 32).
    Returns (w1_big, b1_big, w2_big, b2_big) ready for x_module_forward.
    """
    f32 = jnp.float32
    x_dim = w1.shape[0]

    # zero-pad hidden 100 -> 128 (padded lanes stay exactly 0; leaky_relu(0) = 0)
    w1p = jnp.zeros((x_dim, HIDDEN_PAD), f32).at[:, :HIDDEN].set(w1.astype(f32))
    b1p = jnp.zeros((1, HIDDEN_PAD), f32).at[:, :HIDDEN].set(
        b1.reshape(1, HIDDEN).astype(f32))
    w2p = jnp.zeros((HIDDEN_PAD, OUT), f32).at[:HIDDEN, :].set(w2.astype(f32))
    b2p = b2.reshape(1, OUT).astype(f32)

    # block-diagonal "packed" weights: PACK batch rows share one lane row
    eye = jnp.eye(PACK, dtype=f32)
    w1_big = jnp.kron(eye, w1p).astype(compute_dtype)   # (PACK*x_dim, PACK*128)
    w2_big = jnp.kron(eye, w2p).astype(compute_dtype)   # (PACK*128,  PACK*32)
    b1_big = jnp.tile(b1p, (1, PACK))                   # (1, PACK*128)  f32
    b2_big = jnp.tile(b2p, (1, PACK))                   # (1, PACK*32)   f32
    return w1_big, b1_big, w2_big, b2_big


@functools.partial(jax.jit,
                   static_argnames=("block_rows", "out_dtype", "min_grid"))
def x_module_forward(x, w1_big, b1_big, w2_big, b2_big, *,
                     block_rows=DEFAULT_TB, out_dtype=jnp.float32, min_grid=2):
    """x: (B, x_dim) f32.  Packed weights from pack_params().  Returns (B, 32)."""
    B, x_dim = x.shape
    compute_dtype = w1_big.dtype            # bf16 stream by default; f32 if packed so

    in_w = PACK * x_dim
    hid_w = PACK * HIDDEN_PAD
    out_w = PACK * OUT                      # = 128 -> lane-dense output tile
    assert w1_big.shape == (in_w, hid_w)
    assert w2_big.shape == (hid_w, out_w)

    # ---- batch tiling -----------------------------------------------------------
    sub = 16 if jnp.dtype(compute_dtype) == jnp.bfloat16 else 8
    n_packed_needed = -(-B // PACK)
    # Cap the tile so grid >= min_grid whenever the batch allows it (v7x: feed both
    # TensorCores via dimension_semantics=("parallel",)), while keeping tiles large.
    tb_cap = _round_up(max(-(-n_packed_needed // max(min_grid, 1)), 1), sub)
    tb = max(sub, min(_round_up(block_rows, sub), tb_cap))
    grid = -(-n_packed_needed // tb)
    n_packed = grid * tb
    b_pad = n_packed * PACK

    # ---- tail-only padding + free row-major packing reshape (fuses with cast) ----
    x_c = x.astype(compute_dtype)
    if b_pad != B:
        x_c = jnp.pad(x_c, ((0, b_pad - B), (0, 0)))
    x_packed = x_c.reshape(n_packed, in_w)

    dsize = jnp.dtype(compute_dtype).itemsize
    osize = jnp.dtype(out_dtype).itemsize
    cost = pl.CostEstimate(
        flops=2 * n_packed * (in_w * hid_w + hid_w * out_w),
        transcendentals=0,
        bytes_accessed=(n_packed * in_w * dsize               # x stream
                        + n_packed * out_w * osize            # output stream
                        + (in_w * hid_w + hid_w * out_w) * dsize
                        + (hid_w + out_w) * 4),               # biases (f32)
    )

    out_packed = pl.pallas_call(
        _mlp_kernel,
        out_shape=jax.ShapeDtypeStruct((n_packed, out_w), out_dtype),
        grid=(grid,),
        in_specs=[
            pl.BlockSpec((tb, in_w), lambda i: (i, 0)),        # x tile (streamed)
            pl.BlockSpec((in_w, hid_w), lambda i: (0, 0)),     # W1 (resident)
            pl.BlockSpec((1, hid_w), lambda i: (0, 0)),        # b1 (resident)
            pl.BlockSpec((hid_w, out_w), lambda i: (0, 0)),    # W2 (resident)
            pl.BlockSpec((1, out_w), lambda i: (0, 0)),        # b2 (resident)
        ],
        out_specs=pl.BlockSpec((tb, out_w), lambda i: (i, 0)),
        compiler_params=pltpu.CompilerParams(
            dimension_semantics=("parallel",),   # shards grid across v7x's 2 TCs
            vmem_limit_bytes=32 * 1024 * 1024,   # explicit budget, safe on v7x 64MiB
        ),
        cost_estimate=cost,
    )(x_packed, w1_big, b1_big, w2_big, b2_big)

    # free row-major un-packing reshape, then drop the tail padding
    return out_packed.reshape(b_pad, OUT)[:B, :]


def init_params(key, x_dim, hidden=HIDDEN, out_dim=OUT):
    """Deterministic init mirroring PyTorch nn.Linear defaults
    (uniform in +/- 1/sqrt(fan_in)). Weights stored as (in, out)."""
    k1, k2, k3, k4 = jax.random.split(key, 4)
    bound1 = 1.0 / jnp.sqrt(x_dim)
    bound2 = 1.0 / jnp.sqrt(hidden)
    w1 = jax.random.uniform(k1, (x_dim, hidden), jnp.float32, -bound1, bound1)
    b1 = jax.random.uniform(k2, (1, hidden), jnp.float32, -bound1, bound1)
    w2 = jax.random.uniform(k3, (hidden, out_dim), jnp.float32, -bound2, bound2)
    b2 = jax.random.uniform(k4, (1, out_dim), jnp.float32, -bound2, bound2)
    return w1, b1, w2, b2


if __name__ == "__main__":
    key = jax.random.PRNGKey(0)
    k_x, k_p, k_x2 = jax.random.split(key, 3)

    batch, x_dim = 2, 16
    x = jax.random.normal(k_x, (batch, x_dim), jnp.float32)
    w1, b1, w2, b2 = init_params(k_p, x_dim)

    def ref_fwd(xx):
        h = jnp.dot(xx, w1) + b1
        h = jnp.where(h > 0, h, NEG_SLOPE * h)
        o = jnp.dot(h, w2) + b2
        return jnp.where(o > 0, o, NEG_SLOPE * o)

    # one-time weight packing (hoisted out of the per-call hot path)
    packed_bf16 = jax.block_until_ready(pack_params(w1, b1, w2, b2, jnp.bfloat16))
    packed_f32 = jax.block_until_ready(pack_params(w1, b1, w2, b2, jnp.float32))

    ref = ref_fwd(x)

    # default path: bf16 input/weight streams, f32 accumulation + activation
    out = jax.block_until_ready(x_module_forward(x, *packed_bf16))
    assert out.shape == (batch, OUT)
    assert jnp.allclose(out, ref, atol=5e-2, rtol=5e-2)

    # f32 path: exact nn.Linear numerics
    out_f32 = jax.block_until_ready(x_module_forward(x, *packed_f32))
    assert out_f32.shape == (batch, OUT)
    assert jnp.allclose(out_f32, ref, atol=1e-5, rtol=1e-5)

    # uneven batch: exercises tail-only padding and a multi-step grid
    batch2 = 37
    x2 = jax.random.normal(k_x2, (batch2, x_dim), jnp.float32)
    out2 = jax.block_until_ready(
        x_module_forward(x2, *packed_f32, block_rows=8, min_grid=1))
    assert out2.shape == (batch2, OUT)
    assert jnp.allclose(out2, ref_fwd(x2), atol=1e-5, rtol=1e-5)

    print("KERNEL_OK")
</pallas_src>

<mosaic_0001>
module attributes {stable_mosaic.version = 11 : i64} {
  func.func @_mlp_kernel(%arg0: i32, %arg1: memref<16x64xbf16, #tpu.memory_space<vmem>>, %arg2: memref<64x512xbf16, #tpu.memory_space<vmem>>, %arg3: memref<1x512xf32, #tpu.memory_space<vmem>>, %arg4: memref<512x128xbf16, #tpu.memory_space<vmem>>, %arg5: memref<1x128xf32, #tpu.memory_space<vmem>>, %arg6: memref<16x128xf32, #tpu.memory_space<vmem>>) attributes {dimension_semantics = [#tpu.dimension_semantics<parallel>], iteration_bounds = array<i64: 1>, scalar_prefetch = 0 : i64, scratch_operands = 0 : i64, tpu.core_type = #tpu.core_type<tc>, window_params = [{transform_indices = @transform_0, window_bounds = array<i64: 16, 64>}, {pipeline_mode = #tpu.pipeline_mode<synchronous>, transform_indices = @transform_1, window_bounds = array<i64: 64, 512>}, {pipeline_mode = #tpu.pipeline_mode<synchronous>, transform_indices = @transform_2, window_bounds = array<i64: 1, 512>}, {pipeline_mode = #tpu.pipeline_mode<synchronous>, transform_indices = @transform_3, window_bounds = array<i64: 512, 128>}, {pipeline_mode = #tpu.pipeline_mode<synchronous>, transform_indices = @transform_4, window_bounds = array<i64: 1, 128>}, {transform_indices = @transform_5, window_bounds = array<i64: 16, 128>}]} {
    %c0 = arith.constant 0 : index
    %c0_0 = arith.constant 0 : index
    %0 = vector.load %arg1[%c0, %c0_0] : memref<16x64xbf16, #tpu.memory_space<vmem>>, vector<16x64xbf16>
    %c0_1 = arith.constant 0 : index
    %c0_2 = arith.constant 0 : index
    %1 = vector.load %arg2[%c0_1, %c0_2] : memref<64x512xbf16, #tpu.memory_space<vmem>>, vector<64x512xbf16>
    %cst = arith.constant dense<0.000000e+00> : vector<16x512xf32>
    %2 = tpu.matmul %0, %1, %cst {dimension_numbers = #tpu.dot_dimension_numbers<[1], [0], [0], [1], [0, 0, 1, 1], [], []>} : vector<16x64xbf16>, vector<64x512xbf16>, vector<16x512xf32> -> vector<16x512xf32>
    %c0_3 = arith.constant 0 : index
    %c0_4 = arith.constant 0 : index
    %3 = vector.load %arg3[%c0_3, %c0_4] : memref<1x512xf32, #tpu.memory_space<vmem>>, vector<1x512xf32>
    %4 = vector.broadcast %3 : vector<1x512xf32> to vector<16x512xf32>
    %5 = arith.addf %2, %4 : vector<16x512xf32>
    %cst_5 = arith.constant 0.000000e+00 : f32
    %6 = vector.broadcast %cst_5 : f32 to vector<16x512xf32>
    %7 = arith.cmpf ogt, %5, %6 : vector<16x512xf32>
    %cst_6 = arith.constant 0.00999999977 : f32
    %8 = vector.broadcast %cst_6 : f32 to vector<16x512xf32>
    %9 = arith.mulf %8, %5 : vector<16x512xf32>
    %10 = arith.select %7, %5, %9 : vector<16x512xi1>, vector<16x512xf32>
    %11 = arith.truncf %10 : vector<16x512xf32> to vector<16x512xbf16>
    %c0_7 = arith.constant 0 : index
    %c0_8 = arith.constant 0 : index
    %12 = vector.load %arg4[%c0_7, %c0_8] : memref<512x128xbf16, #tpu.memory_space<vmem>>, vector<512x128xbf16>
    %cst_9 = arith.constant dense<0.000000e+00> : vector<16x128xf32>
    %13 = tpu.matmul %11, %12, %cst_9 {dimension_numbers = #tpu.dot_dimension_numbers<[1], [0], [0], [1], [0, 0, 1, 1], [], []>} : vector<16x512xbf16>, vector<512x128xbf16>, vector<16x128xf32> -> vector<16x128xf32>
    %c0_10 = arith.constant 0 : index
    %c0_11 = arith.constant 0 : index
    %14 = vector.load %arg5[%c0_10, %c0_11] : memref<1x128xf32, #tpu.memory_space<vmem>>, vector<1x128xf32>
    %15 = vector.broadcast %14 : vector<1x128xf32> to vector<16x128xf32>
    %16 = arith.addf %13, %15 : vector<16x128xf32>
    %cst_12 = arith.constant 0.000000e+00 : f32
    %17 = vector.broadcast %cst_12 : f32 to vector<16x128xf32>
    %18 = arith.cmpf ogt, %16, %17 : vector<16x128xf32>
    %cst_13 = arith.constant 0.00999999977 : f32
    %19 = vector.broadcast %cst_13 : f32 to vector<16x128xf32>
    %20 = arith.mulf %19, %16 : vector<16x128xf32>
    %21 = arith.select %18, %16, %20 : vector<16x128xi1>, vector<16x128xf32>
    %c0_14 = arith.constant 0 : index
    %c0_15 = arith.constant 0 : index
    %22 = vector.load %arg6[%c0_14, %c0_15] : memref<16x128xf32, #tpu.memory_space<vmem>>, vector<16x128xf32>
    tpu.vector_store %arg6[%c0_14, %c0_15], %21 {strides = array<i32>} : memref<16x128xf32, #tpu.memory_space<vmem>>, vector<16x128xf32>,
    return
  }
  func.func @transform_0(%arg0: i32) -> (i32, i32) {
    %c0_i32 = arith.constant 0 : i32
    %c0_i32_0 = arith.constant 0 : i32
    return %arg0, %c0_i32 : i32, i32
  }
  func.func @transform_1(%arg0: i32) -> (i32, i32) {
    %c0_i32 = arith.constant 0 : i32
    %c0_i32_0 = arith.constant 0 : i32
    %c0_i32_1 = arith.constant 0 : i32
    return %c0_i32, %c0_i32_0 : i32, i32
  }
  func.func @transform_2(%arg0: i32) -> (i32, i32) {
    %c0_i32 = arith.constant 0 : i32
    %c0_i32_0 = arith.constant 0 : i32
    %c0_i32_1 = arith.constant 0 : i32
    return %c0_i32, %c0_i32_0 : i32, i32
  }
  func.func @transform_3(%arg0: i32) -> (i32, i32) {
    %c0_i32 = arith.constant 0 : i32
    %c0_i32_0 = arith.constant 0 : i32
    %c0_i32_1 = arith.constant 0 : i32
    return %c0_i32, %c0_i32_0 : i32, i32
  }
  func.func @transform_4(%arg0: i32) -> (i32, i32) {
    %c0_i32 = arith.constant 0 : i32
    %c0_i32_0 = arith.constant 0 : i32
    %c0_i32_1 = arith.constant 0 : i32
    return %c0_i32, %c0_i32_0 : i32, i32
  }
  func.func @transform_5(%arg0: i32) -> (i32, i32) {
    %c0_i32 = arith.constant 0 : i32
    %c0_i32_0 = arith.constant 0 : i32
    return %arg0, %c0_i32 : i32, i32
  }
}

</mosaic_0001>

<bundles_post_ra>
// kernel: x_module_forward.1
= control target key start
LH: loop header
LB: loop body
LE: loop exit
PB: predicated region body
PF: predicated region fallthrough
CT: control target
= control target key end

     0   :  { %10 = vsyncpa [#allocation3], 0  ;;  %s949_s0 = inlined_call_operand.vmem [shape: bf16[16,64], index: 0, kind: input, shape index: {}]   ;;  %s950_s1 = inlined_call_operand.hbm [shape: bf16[64,512], index: 1, kind: input, shape index: {}]   ;;  %s951_s2 = inlined_call_operand.vmem [shape: f32[1,512], index: 2, kind: input, shape index: {}]   ;;  %s952_s3 = inlined_call_operand.hbm [shape: bf16[512,128], index: 3, kind: input, shape index: {}]   ;;  %s953_s4 = inlined_call_operand.vmem [shape: f32[1,128], index: 4, kind: input, shape index: {}]   ;;  %s954_s5 = inlined_call_operand.vmem [shape: f32[16,128], index: 5, kind: output, shape index: {}]  }
   0x1   :  { %s18_s20 = sshll.u32 %s950_s1, 4  ;;  %s19_s20 = int_to_ptr.hbm [resolvable:$true] %s18_s20 }
   0x2   :  { %11 = vsyncpa [#allocation5], 0  ;;  %s892_s21 = smov [#allocation2]   ;;  %s33_s25 = sshll.u32 %s952_s3, 4  ;;  %s34_s25 = int_to_ptr.hbm [resolvable:$true] %s33_s25 }
   0x3   :  { %s20_s22 = sshll.u32 %s892_s21, 4  ;;  %s893_s26 = smov 256   ;;  %s21_s22 = int_to_ptr.vmem [resolvable:$true] %s20_s22 }
   0x4   :  { %s894_s27 = smov 16   ;;  %s895_s28 = smov [#allocation4]  }
   0x5   :  { %26 = dma.hbm_to_vmem [thread:$0]  %s19_s20, 2048, %s21_s22, [#allocation3], %s893_s26, %s893_s26, %s894_s27  }
   0x6   :  { %s35_s29 = sshll.u32 %s895_s28, 4  ;;  %s896_s30 = smov 64   ;;  %s36_s29 = int_to_ptr.vmem [resolvable:$true] %s35_s29 }
   0x7   :  { %s897_s6 = smov 4  }
   0x8   :  { %41 = dma.hbm_to_vmem [thread:$0]  %s34_s25, 4096, %s36_s29, [#allocation5], %s896_s30, %s896_s30, %s897_s6  }
   0x9   :  { %888 = dma.done.wait [#allocation3], 2048  }
   0xa   :  { %889 = vsyncadd [#allocation3], 4294965248 }
   0xb   :  { %890 = dma.done.wait [#allocation5], 4096  }
   0xc   :  { %891 = vsyncadd [#allocation5], 4294963200  ;;  %v638_v0 = vld [vmem:[#allocation2 + $0x60] sm:$0xf]  ;;  %v799_v1 = vld [vmem:[#allocation2 + $0x6c] sm:$0xf0] }
   0xd   :  { %v797_v2 = vld [vmem:[#allocation2 + $0x64] sm:$0xf]  ;;  %v639_v3 = vor.u32 %v799_v1, %v638_v0  ;;  %v640_v4 = vld [vmem:[#allocation2 + $0x70] sm:$0xf0]  ;;  %v646_v5 = vld [vmem:[#allocation2 + $0x68] sm:$0xf] }
   0xe   :  { %v800_v6 = vld [vmem:[#allocation2 + $0x74] sm:$0xf0]  ;;  %v643_v7 = vor.u32 %v797_v2, %v640_v4  ;;  %v798_v9 = vld [vmem:[#allocation2 + $0x6c] sm:$0xf]  ;;  %v648_v10 = vld [vmem:[#allocation2 + $0x78] sm:$0xf0] }
   0xf   :  { %v647_v8 = vor.u32 %v800_v6, %v646_v5  ;;  %v622_v11 = vld [vmem:[#allocation2 + $0x40] sm:$0xf]  ;;  %174 = vmatpush.bf16.msra.mxu0 %v639_v3  ;;  %v651_v12 = vor.u32 %v798_v9, %v648_v10  ;;  %v795_v13 = vld [vmem:[#allocation2 + $0x4c] sm:$0xf0]  ;;  %v793_v14 = vld [vmem:[#allocation2 + $0x44] sm:$0xf] }
  0x10   :  { %v624_v15 = vld [vmem:[#allocation2 + $0x50] sm:$0xf0]  ;;  %188 = vmatpush.bf16.msra.mxu1 %v643_v7  ;;  %v623_v16 = vor.u32 %v795_v13, %v622_v11  ;;  %v630_v18 = vld [vmem:[#allocation2 + $0x48] sm:$0xf]  ;;  %v796_v19 = vld [vmem:[#allocation2 + $0x54] sm:$0xf0] }
  0x11   :  { %202 = vmatpush.bf16.msra.mxu2 %v647_v8  ;;  %v627_v17 = vor.u32 %v793_v14, %v624_v15  ;;  %v794_v20 = vld [vmem:[#allocation2 + $0x4c] sm:$0xf]  ;;  %216 = vmatpush.bf16.msra.mxu3 %v651_v12  ;;  %v631_v21 = vor.u32 %v796_v19, %v630_v18  ;;  %v632_v22 = vld [vmem:[#allocation2 + $0x58] sm:$0xf0]  ;;  %v606_v23 = vld [vmem:[#allocation2 + $0x20] sm:$0xf] }
  0x12   :  { %v791_v24 = vld [vmem:[#allocation2 + $0x2c] sm:$0xf0]  ;;  %v635_v25 = vor.u32 %v794_v20, %v632_v22  ;;  %v789_v26 = vld [vmem:[#allocation2 + $0x24] sm:$0xf]  ;;  %v608_v27 = vld [vmem:[#allocation2 + $0x30] sm:$0xf0] }
  0x13   :  { %v614_v28 = vld [vmem:[#allocation2 + $0x28] sm:$0xf]  ;;  %175 = vmatpush.bf16.msra.mxu0 %v623_v16  ;;  %v607_v29 = vor.u32 %v791_v24, %v606_v23  ;;  %v792_v30 = vld [vmem:[#allocation2 + $0x34] sm:$0xf0]  ;;  %v790_v31 = vld [vmem:[#allocation2 + $0x2c] sm:$0xf]  ;;  %v611_v33 = vor.u32 %v789_v26, %v608_v27 }
  0x14   :  { %v616_v32 = vld [vmem:[#allocation2 + $0x38] sm:$0xf0]  ;;  %189 = vmatpush.bf16.msra.mxu1 %v627_v17  ;;  %v615_v34 = vor.u32 %v792_v30, %v614_v28  ;;  %v590_v35 = vld [vmem:[#allocation2] sm:$0xf]  ;;  %v787_v36 = vld [vmem:[#allocation2 + $0xc] sm:$0xf0] }
  0x15   :  { %203 = vmatpush.bf16.msra.mxu2 %v631_v21  ;;  %v785_v37 = vld [vmem:[#allocation2 + $0x4] sm:$0xf]  ;;  %217 = vmatpush.bf16.msra.mxu3 %v635_v25  ;;  %v619_v38 = vor.u32 %v790_v31, %v616_v32  ;;  %v592_v39 = vld [vmem:[#allocation2 + $0x10] sm:$0xf0]  ;;  %v598_v40 = vld [vmem:[#allocation2 + $0x8] sm:$0xf]  ;;  %v591_v44 = vor.u32 %v787_v36, %v590_v35 }
  0x16   :  { %v788_v41 = vld [vmem:[#allocation2 + $0x14] sm:$0xf0]  ;;  %v786_v42 = vld [vmem:[#allocation2 + $0xc] sm:$0xf]  ;;  %v600_v43 = vld [vmem:[#allocation2 + $0x18] sm:$0xf0]  ;;  %v595_v45 = vor.u32 %v785_v37, %v592_v39 }
  0x17   :  { %176 = vmatpush.bf16.msra.mxu0 %v607_v29  ;;  %v599_v46 = vor.u32 %v788_v41, %v598_v40  ;;  %v603_v47 = vor.u32 %v786_v42, %v600_v43  ;;  %v808_v48 = vld [vmem:[#allocation4 + $0x38] sm:$0xff]  ;;  %v784_v49 = vld [vmem:[%s949_s0] sm:$0xff]  ;;  %vm166_vm0 = vcmask 523264   ;;  %v807_v52 = vld [vmem:[#allocation4 + $0x30] sm:$0xff] }
  0x18   :  { %190 = vmatpush.bf16.msra.mxu1 %v611_v33  ;;  %v816_v50 = vld [vmem:[#allocation4 + $0x78] sm:$0xff]  ;;  %v815_v54 = vld [vmem:[#allocation4 + $0x70] sm:$0xff]  ;;  %v806_v56 = vld [vmem:[#allocation4 + $0x28] sm:$0xff] }
  0x19   :  { %204 = vmatpush.bf16.msra.mxu2 %v615_v34  ;;  %218 = vmatpush.bf16.msra.mxu3 %v619_v38  ;;  %v824_v51 = vld [vmem:[#allocation4 + $0xb8] sm:$0xff]  ;;  %v823_v55 = vld [vmem:[#allocation4 + $0xb0] sm:$0xff]  ;;  %v814_v58 = vld [vmem:[#allocation4 + $0x68] sm:$0xff] }
  0x1a   :  { %v832_v53 = vld [vmem:[#allocation4 + $0xf8] sm:$0xff]  ;;  %v831_v57 = vld [vmem:[#allocation4 + $0xf0] sm:$0xff]  ;;  %v822_v59 = vld [vmem:[#allocation4 + $0xa8] sm:$0xff] }
  0x1b   :  { %177 = vmatpush.bf16.msra.mxu0 %v591_v44  ;;  %v805_v60 = vld [vmem:[#allocation4 + $0x20] sm:$0xff]  ;;  %v830_v61 = vld [vmem:[#allocation4 + $0xe8] sm:$0xff]  ;;  %v804_v63 = vld [vmem:[#allocation4 + $0x18] sm:$0xff] }
  0x1c   :  { %191 = vmatpush.bf16.msra.mxu1 %v595_v45  ;;  %v813_v62 = vld [vmem:[#allocation4 + $0x60] sm:$0xff]  ;;  %v812_v0 = vld [vmem:[#allocation4 + $0x58] sm:$0xff]  ;;  %v803_v3 = vld [vmem:[#allocation4 + $0x10] sm:$0xff] }
  0x1d   :  { %205 = vmatpush.bf16.msra.mxu2 %v599_v46  ;;  %219 = vmatpush.bf16.msra.mxu3 %v603_v47  ;;  %v821_v1 = vld [vmem:[#allocation4 + $0xa0] sm:$0xff]  ;;  %v811_v4 = vld [vmem:[#allocation4 + $0x50] sm:$0xff]  ;;  %v820_v5 = vld [vmem:[#allocation4 + $0x98] sm:$0xff] }
  0x1e   :  { %652 = vmatmul.msk.bf16.vlgmr.msra.gmra.mxu0 %vm166_vm0, %v784_v49  ;;  %v829_v2 = vld [vmem:[#allocation4 + $0xe0] sm:$0xff]  ;;  %v828_v6 = vld [vmem:[#allocation4 + $0xd8] sm:$0xff]  ;;  %v802_v7 = vld [vmem:[#allocation4 + $0x8] sm:$0xff] }
  0x1f   :  { %514 = vmatpush.bf16.msrb.mxu0 %v808_v48  ;;  %653 = vmatmul.msk.bf16.vlgmr.msra.gmra.mxu1 %vm166_vm0, %v784_v49  ;;  %v810_v8 = vld [vmem:[#allocation4 + $0x48] sm:$0xff]  ;;  %v819_v9 = vld [vmem:[#allocation4 + $0x90] sm:$0xff]  ;;  %v801_v11 = vld [vmem:[#allocation4] sm:$0xff] }
  0x20   :  { %528 = vmatpush.bf16.msrb.mxu1 %v816_v50  ;;  %654 = vmatmul.msk.bf16.vlgmr.msra.gmra.mxu2 %vm166_vm0, %v784_v49  ;;  %v827_v10 = vld [vmem:[#allocation4 + $0xd0] sm:$0xff]  ;;  %v809_v12 = vld [vmem:[#allocation4 + $0x40] sm:$0xff]  ;;  %v818_v13 = vld [vmem:[#allocation4 + $0x88] sm:$0xff] }
  0x21   :  { %655 = vmatmul.msk.bf16.vlgmr.msra.gmra.mxu3 %vm166_vm0, %v784_v49  ;;  %542 = vmatpush.bf16.msrb.mxu2 %v824_v51  ;;  %v826_v14 = vld [vmem:[#allocation4 + $0xc8] sm:$0xff]  ;;  %v817_v15 = vld [vmem:[#allocation4 + $0x80] sm:$0xff] }
  0x22   :  { %556 = vmatpush.bf16.msrb.mxu3 %v832_v53  ;;  %v825_v16 = vld [vmem:[#allocation4 + $0xc0] sm:$0xff] }
  0x23   :  { %515 = vmatpush.bf16.msrb.mxu0 %v807_v52  ;;  %v71_v17 = vld [vmem:[%s951_s2] sm:$0xf] }
  0x24   :  { %529 = vmatpush.bf16.msrb.mxu1 %v815_v54  ;;  %v74_v19 = vperm.slane %v71_v17, 1  ;;  %v73_v20 = vperm.slane %v71_v17, 0  ;;  %v75_v26 = vperm.slane %v71_v17, 2  ;;  %v76_v30 = vperm.slane %v71_v17, 3 }
  0x25   :  { %543 = vmatpush.bf16.msrb.mxu2 %v823_v55 }
  0x26   :  { %557 = vmatpush.bf16.msrb.mxu3 %v831_v57 }
  0x27   :  { %516 = vmatpush.bf16.msrb.mxu0 %v806_v56 }
  0x28   :  { %530 = vmatpush.bf16.msrb.mxu1 %v814_v58 }
  0x29   :  { %544 = vmatpush.bf16.msrb.mxu2 %v822_v59  ;;  %v839_v59 = vld [vmem:[%s953_s4] ss:$0 sm:$0xff] }
  0x2a   :  { %558 = vmatpush.bf16.msrb.mxu3 %v830_v61 }
  0x2b   :  { %517 = vmatpush.bf16.msrb.mxu0 %v805_v60 }
  0x2c   :  { %531 = vmatpush.bf16.msrb.mxu1 %v813_v62 }
  0x2d   :  { %545 = vmatpush.bf16.msrb.mxu2 %v821_v1 }
  0x2e   :  { %559 = vmatpush.bf16.msrb.mxu3 %v829_v2 }
  0x2f   :  { %518 = vmatpush.bf16.msrb.mxu0 %v804_v63 }
  0x30   :  { %532 = vmatpush.bf16.msrb.mxu1 %v812_v0 }
  0x31   :  { %546 = vmatpush.bf16.msrb.mxu2 %v820_v5 }
  0x32   :  { %560 = vmatpush.bf16.msrb.mxu3 %v828_v6 }
  0x33   :  { %519 = vmatpush.bf16.msrb.mxu0 %v803_v3 }
  0x34   :  { %533 = vmatpush.bf16.msrb.mxu1 %v811_v4 }
  0x35   :  { %547 = vmatpush.bf16.msrb.mxu2 %v819_v9 }
  0x36   :  { %561 = vmatpush.bf16.msrb.mxu3 %v827_v10 }
  0x37   :  { %520 = vmatpush.bf16.msrb.mxu0 %v802_v7 }
  0x38   :  { %534 = vmatpush.bf16.msrb.mxu1 %v810_v8 }
  0x39   :  { %548 = vmatpush.bf16.msrb.mxu2 %v818_v13 }
  0x3a   :  { %562 = vmatpush.bf16.msrb.mxu3 %v826_v14 }
  0x3b   :  { %521 = vmatpush.bf16.msrb.mxu0 %v801_v11 }
  0x3c   :  { %535 = vmatpush.bf16.msrb.mxu1 %v809_v12 }
  0x3d   :  { %549 = vmatpush.bf16.msrb.mxu2 %v817_v15 }
  0x3e   :  { %563 = vmatpush.bf16.msrb.mxu3 %v825_v16 }
  0x9b   :  { %v179_v18 = vpop.f32.mrf.mxu0 }
  0x9c   :  { %v193_v21 = vpop.f32.mrf.mxu1  ;;  %v180_v23 = vadd.f32 %v179_v18, %v73_v20 }
  0x9d   :  { %v194_v22 = vadd.f32 %v193_v21, %v74_v19 }
  0x9e   :  { %v234_v29 = vmul.f32 0.01, %v180_v23  ;;  %vm226_vm2 = vcmp.gt.f32.partialorder %v180_v23, 0.0 }
  0x9f   :  { %v235_v25 = vmul.f32 0.01, %v194_v22  ;;  %vm227_vm1 = vcmp.gt.f32.partialorder %v194_v22, 0.0 }
  0xa0   :  { %v242_v39 = vsel %vm226_vm2, %v180_v23, %v234_v29 }
  0xa1   :  { %v243_v37 = vsel %vm227_vm1, %v194_v22, %v235_v25 }
  0xa3   :  { %v207_v24 = vpop.f32.mrf.mxu2  ;;  %v181_v28 = vpop.f32.mrf.mxu0 }
  0xa4   :  { %v221_v27 = vpop.f32.mrf.mxu3  ;;  %v182_v31 = vadd.f32 %v181_v28, %v73_v20  ;;  %v195_v32 = vpop.f32.mrf.mxu1  ;;  %v208_v35 = vadd.f32 %v207_v24, %v75_v26 }
  0xa5   :  { %v196_v33 = vadd.f32 %v195_v32, %v74_v19  ;;  %v222_v38 = vadd.f32 %v221_v27, %v76_v30 }
  0xa6   :  { %vm230_vm3 = vcmp.gt.f32.partialorder %v182_v31, 0.0  ;;  %v238_v34 = vmul.f32 0.01, %v182_v31  ;;  %v236_v45 = vmul.f32 0.01, %v208_v35  ;;  %vm228_vm5 = vcmp.gt.f32.partialorder %v208_v35, 0.0 }
  0xa7   :  { %vm231_vm4 = vcmp.gt.f32.partialorder %v196_v33, 0.0  ;;  %v239_v36 = vmul.f32 0.01, %v196_v33  ;;  %v237_v48 = vmul.f32 0.01, %v222_v38  ;;  %vm229_vm6 = vcmp.gt.f32.partialorder %v222_v38, 0.0 }
  0xa8   :  { %v246_v40 = vsel %vm230_vm3, %v182_v31, %v238_v34  ;;  %v244_v52 = vsel %vm228_vm5, %v208_v35, %v236_v45 }
  0xa9   :  { %v250_v41 = vpack.c.bf16 %v246_v40, %v242_v39  ;;  %v247_v42 = vsel %vm231_vm4, %v196_v33, %v239_v36  ;;  %v245_v55 = vsel %vm229_vm6, %v222_v38, %v237_v48 }
  0xaa   :  { %v251_v44 = vpack.c.bf16 %v247_v42, %v243_v37 }
  0xab   :  { %v209_v43 = vpop.f32.mrf.mxu2  ;;  %522 = vmatmul.bf16.vlgmr.msrb.gmra.mxu0 %v250_v41 }
  0xac   :  { %v210_v46 = vadd.f32 %v209_v43, %v75_v26  ;;  %v223_v47 = vpop.f32.mrf.mxu3  ;;  %536 = vmatmul.bf16.vlgmr.msrb.gmra.mxu1 %v251_v44 }
  0xad   :  { %v224_v49 = vadd.f32 %v223_v47, %v76_v30 }
  0xae   :  { %vm232_vm7 = vcmp.gt.f32.partialorder %v210_v46, 0.0  ;;  %v240_v50 = vmul.f32 0.01, %v210_v46 }
  0xaf   :  { %vm233_vm8 = vcmp.gt.f32.partialorder %v224_v49, 0.0  ;;  %v241_v51 = vmul.f32 0.01, %v224_v49 }
  0xb0   :  { %v248_v53 = vsel %vm232_vm7, %v210_v46, %v240_v50 }
  0xb1   :  { %v252_v54 = vpack.c.bf16 %v248_v53, %v244_v52  ;;  %v249_v56 = vsel %vm233_vm8, %v224_v49, %v241_v51 }
  0xb2   :  { %v253_v57 = vpack.c.bf16 %v249_v56, %v245_v55 }
  0xb3   :  { %550 = vmatmul.bf16.vlgmr.msrb.gmra.mxu2 %v252_v54 }
  0xb4   :  { %564 = vmatmul.bf16.vlgmr.msrb.gmra.mxu3 %v253_v57 }
 0x128   :  { %v523_v58 = vpop.f32.mrf.mxu0 }
 0x129   :  { %v524_v60 = vadd.f32 %v839_v59, %v523_v58  ;;  %v537_v61 = vpop.f32.mrf.mxu1 }
 0x12b   :  { %v538_v62 = vadd.f32 %v537_v61, %v524_v60 }
 0x130   :  { %v525_v63 = vpop.f32.mrf.mxu0 }
 0x131   :  { %v526_v3 = vadd.f32 %v839_v59, %v525_v63  ;;  %v539_v6 = vpop.f32.mrf.mxu1 }
 0x133   :  { %v540_v7 = vadd.f32 %v539_v6, %v526_v3 }
 0x136   :  { %v551_v0 = vpop.f32.mrf.mxu2 }
 0x137   :  { %v552_v1 = vadd.f32 %v551_v0, %v538_v62  ;;  %v565_v2 = vpop.f32.mrf.mxu3 }
 0x139   :  { %v566_v4 = vadd.f32 %v565_v2, %v552_v1 }
 0x13b   :  { %vm570_vm9 = vcmp.gt.f32.partialorder %v566_v4, 0.0  ;;  %v572_v5 = vmul.f32 0.01, %v566_v4 }
 0x13d   :  { %v574_v8 = vsel %vm570_vm9, %v566_v4, %v572_v5 }
 0x13e   :  { %576 = vst [vmem:[%s954_s5] sm:$0xff] %v574_v8  ;;  %v553_v9 = vpop.f32.mrf.mxu2 }
 0x13f   :  { %v554_v10 = vadd.f32 %v553_v9, %v540_v7  ;;  %v567_v11 = vpop.f32.mrf.mxu3 }
 0x141   :  { %v568_v12 = vadd.f32 %v567_v11, %v554_v10 }
 0x143   :  { %vm571_vm10 = vcmp.gt.f32.partialorder %v568_v12, 0.0  ;;  %v573_v13 = vmul.f32 0.01, %v568_v12 }
 0x145   :  { %v575_v14 = vsel %vm571_vm10, %v568_v12, %v573_v13 }
 0x146   :  { %577 = vst [vmem:[%s954_s5 + $0x8] sm:$0xff] %v575_v14 }
 0x147   :  { %582 = vsyncpa [#allocation3], 1 }
 0x148   :  { %583 = vsyncpa [#allocation5], 1 }

</bundles_post_ra>
